<compile_context>
chip_gen: v5e
topology: v5e:2x2
jax: 0.10.0
libtpu: 0.0.40
codegen_flags: <defaults>
</compile_context>

<pallas_src>
import math
import functools

import jax
import jax.numpy as jnp
from jax.experimental import pallas as pl
from jax.experimental.pallas import tpu as pltpu

_NEG = -1000000000.0  # plain Python float: folded into the kernel, never captured

# Per-output-block budget in *padded* VMEM bytes; BlockSpec double-buffers the
# output, so real usage is ~2x this.  4 MiB -> ~8 MiB, safe even for v5e's
# 16 MiB scoped-VMEM default.
_VMEM_BLOCK_BUDGET_BYTES = 4 * 1024 * 1024
# Above this total output size, prefer >= 2 grid steps (v7x has 2 TensorCores).
_SPLIT_THRESHOLD_BYTES = 1 * 1024 * 1024


def _mock_generator_kernel(nid_ref, out_ref, *, vocab, last_block, last_row_in_block):
    # nid_ref : VMEM (batch, 1) int32  -- next-token id per batch row
    # out_ref : VMEM (batch, sb*vocab) f32 -- flattened (seq, vocab) slab
    batch, _ = out_ref.shape

    # 1) Constant fill: single lane-dense broadcast store over the whole block.
    out_ref[...] = jnp.full(out_ref.shape, _NEG, dtype=jnp.float32)

    # 2) Only the block containing the global last sequence row gets the one-hot.
    @pl.when(pl.program_id(0) == last_block)
    def _():
        col = jax.lax.broadcasted_iota(jnp.int32, (batch, vocab), 1)
        one_hot = jnp.where(col == nid_ref[...], 1.0, _NEG).astype(jnp.float32)
        out_ref[:, pl.ds(last_row_in_block * vocab, vocab)] = one_hot


def _choose_seq_tile(batch: int, seq_len: int, vocab: int) -> int:
    """Pick the per-block sequence tile for the flattened (batch, seq*vocab) output.

    * sb * vocab must be a multiple of 128 (lane-dense) unless sb == seq_len
      (a full-extent block dim is always legal).
    * padded (sublane-rounded batch), double-buffered block stays inside the
      smallest scoped-VMEM default.
    * large outputs keep >= 2 grid steps so both v7x TensorCores are used.
    """
    step = 128 // math.gcd(vocab, 128)            # sb must be a multiple of this
    padded_batch = ((batch + 7) // 8) * 8         # sublane padding
    row_bytes = padded_batch * vocab * 4          # real VMEM bytes per seq row
    total_bytes = row_bytes * seq_len

    if seq_len < 2 * step:
        # Cannot split into lane-dense tiles; take the whole sequence as one block.
        return seq_len

    # Largest lane-dense tile within the per-block budget, capped at seq_len.
    sb = min(_VMEM_BLOCK_BUDGET_BYTES // row_bytes, seq_len) // step * step
    sb = max(sb, step)

    # Keep at least 2 grid steps when the output is sizable (v7x: 2 TCs).
    if total_bytes > _SPLIT_THRESHOLD_BYTES and sb * 2 > seq_len:
        sb = max(step, (seq_len // 2) // step * step)
    return sb


def mock_generator_forward(input_ids: jax.Array, vocab_size: int = 30) -> jax.Array:
    """input_ids: (batch, seq_len) int -> (batch, seq_len, vocab_size) float32."""
    batch, seq_len = input_ids.shape
    input_ids = input_ids.astype(jnp.int32)

    # next-token ids, as a tiny (batch, 1) VMEM input for a vectorized one-hot.
    next_ids = ((input_ids[:, -1] + 1) % jnp.int32(vocab_size)).reshape(batch, 1)

    sb = _choose_seq_tile(batch, seq_len, vocab_size)
    num_tiles = pl.cdiv(seq_len, sb)
    last_block = (seq_len - 1) // sb              # block holding the global last row
    last_row_in_block = (seq_len - 1) % sb        # its in-block row

    kernel = functools.partial(
        _mock_generator_kernel,
        vocab=vocab_size,
        last_block=last_block,
        last_row_in_block=last_row_in_block,
    )

    flat = pl.pallas_call(
        kernel,
        out_shape=jax.ShapeDtypeStruct((batch, seq_len * vocab_size), jnp.float32),
        grid=(num_tiles,),
        in_specs=[pl.BlockSpec((batch, 1), lambda j: (0, 0))],
        out_specs=pl.BlockSpec((batch, sb * vocab_size), lambda j: (0, j)),
        compiler_params=pltpu.CompilerParams(dimension_semantics=("parallel",)),
    )(next_ids)

    # Contiguous reshape back to (batch, seq_len, vocab): layout-preserving, no copy.
    return flat.reshape(batch, seq_len, vocab_size)


def _reference(input_ids: jax.Array, vocab_size: int = 30) -> jax.Array:
    batch, seq_len = input_ids.shape
    next_ids = (input_ids[:, -1].astype(jnp.int32) + 1) % vocab_size
    full = jnp.full((batch, seq_len, vocab_size), -1000000000.0, dtype=jnp.float32)
    one_hot = jnp.where(
        jnp.arange(vocab_size)[None, :] == next_ids[:, None],
        jnp.float32(1.0), jnp.float32(-1000000000.0))
    return full.at[:, -1, :].set(one_hot)


if __name__ == "__main__":
    vocab_size = 30
    batch, seq_len = 2, 8

    key = jax.random.PRNGKey(0)
    input_ids = jax.random.randint(key, (batch, seq_len), 0, vocab_size, dtype=jnp.int32)

    logits = mock_generator_forward(input_ids, vocab_size)
    jax.block_until_ready(logits)

    ref = _reference(input_ids, vocab_size)
    assert logits.shape == (batch, seq_len, vocab_size)
    assert logits.dtype == jnp.float32
    assert bool(jnp.all(logits == ref))

    print("KERNEL_OK")
</pallas_src>

<mosaic_0001>
module attributes {stable_mosaic.version = 11 : i64} {
  func.func @_mock_generator_kernel(%arg0: i32, %arg1: memref<2x1xi32, #tpu.memory_space<vmem>>, %arg2: memref<2x240xf32, #tpu.memory_space<vmem>>) attributes {dimension_semantics = [#tpu.dimension_semantics<parallel>], iteration_bounds = array<i64: 1>, scalar_prefetch = 0 : i64, scratch_operands = 0 : i64, tpu.core_type = #tpu.core_type<tc>, window_params = [{pipeline_mode = #tpu.pipeline_mode<synchronous>, transform_indices = @transform_0, window_bounds = array<i64: 2, 1>}, {transform_indices = @transform_1, window_bounds = array<i64: 2, 240>}]} {
    %cst = arith.constant -1.000000e+09 : f32
    %0 = vector.broadcast %cst : f32 to vector<2x240xf32>
    %c0 = arith.constant 0 : index
    %c0_0 = arith.constant 0 : index
    %1 = vector.load %arg2[%c0, %c0_0] : memref<2x240xf32, #tpu.memory_space<vmem>>, vector<2x240xf32>
    tpu.vector_store %arg2[%c0, %c0_0], %0 {strides = array<i32>} : memref<2x240xf32, #tpu.memory_space<vmem>>, vector<2x240xf32>,
    %c0_i32 = arith.constant 0 : i32
    %2 = arith.cmpi eq, %arg0, %c0_i32 : i32
    %3 = arith.extui %2 : i1 to i32
    %c0_i32_1 = arith.constant 0 : i32
    %4 = arith.cmpi ne, %3, %c0_i32_1 : i32
    scf.if %4 {
      %5 = tpu.iota {dimensions = array<i32: 1>} : vector<2x30xi32>
      %c0_2 = arith.constant 0 : index
      %c0_3 = arith.constant 0 : index
      %6 = vector.load %arg1[%c0_2, %c0_3] : memref<2x1xi32, #tpu.memory_space<vmem>>, vector<2x1xi32>
      %7 = vector.broadcast %6 : vector<2x1xi32> to vector<2x30xi32>
      %8 = arith.cmpi eq, %5, %7 : vector<2x30xi32>
      %cst_4 = arith.constant 1.000000e+00 : f32
      %cst_5 = arith.constant -1.000000e+09 : f32
      %9 = vector.broadcast %cst_4 : f32 to vector<2x30xf32>
      %10 = vector.broadcast %cst_5 : f32 to vector<2x30xf32>
      %11 = arith.select %8, %9, %10 : vector<2x30xi1>, vector<2x30xf32>
      %c0_6 = arith.constant 0 : index
      %c210 = arith.constant 210 : index
      %12 = vector.load %arg2[%c0_6, %c210] : memref<2x240xf32, #tpu.memory_space<vmem>>, vector<2x30xf32>
      tpu.vector_store %arg2[%c0_6, %c210], %11 {strides = array<i32>} : memref<2x240xf32, #tpu.memory_space<vmem>>, vector<2x30xf32>,
    } else {
    }
    return
  }
  func.func @transform_0(%arg0: i32) -> (i32, i32) {
    %c0_i32 = arith.constant 0 : i32
    %c0_i32_0 = arith.constant 0 : i32
    %c0_i32_1 = arith.constant 0 : i32
    return %c0_i32, %c0_i32_0 : i32, i32
  }
  func.func @transform_1(%arg0: i32) -> (i32, i32) {
    %c0_i32 = arith.constant 0 : i32
    %c0_i32_0 = arith.constant 0 : i32
    return %c0_i32, %arg0 : i32, i32
  }
}

</mosaic_0001>

<bundles_post_ra>
// kernel: tpu_custom_call.1
= control target key start
LH: loop header
LB: loop body
LE: loop exit
PB: predicated region body
PF: predicated region fallthrough
CT: control target
= control target key end

     0   :  { %s98_s0 = inlined_call_operand.vmem [shape: s32[2,1], index: 0, kind: input, shape index: {}]   ;;  %s99_s1 = inlined_call_operand.hbm [shape: f32[2,240], index: 1, kind: output, shape index: {}]  }
   0x1   :  { %v19_v0 = vld [vmem:[%s98_s0] sm:$0x3] }
   0x2   :  { %6 = vsyncpa [#allocation3], 0  ;;  %v78_v1 = vmov 0   ;;  %vm9_vm0 = vcmask 1041408   ;;  %vm10_vm1 = vcmask 912386   ;;  %v17_v3 = vlaneseq  ;;  %s80_s8 = smov 82  }
   0x3   :  { %51 = vset.pattern.permute.xlu0 %v78_v1  ;;  %vm11_vm2 = vmor %vm10_vm1, %vm9_vm0  ;;  %v79_v2 = vmov -1e+09   ;;  %s81_s9 = smov [#allocation2]   ;;  %s38_s12 = sshll.u32 %s99_s1, 4  ;;  %vm29_vm4 = vcmask 910992   ;;  %s39_s12 = int_to_ptr.hbm [resolvable:$true] %s38_s12 }
   0x4   :  { %21 = vperm.xlu0 %51, %v19_v0   ;;  %12 = vst.msk [vmem:[#allocation2] sm:$0xf] %vm11_vm2, %v79_v2  ;;  %v18_v4 = vand.u32 127, %v17_v3  ;;  %s36_s10 = sshll.u32 %s81_s9, 4  ;;  %s37_s10 = int_to_ptr.vmem [resolvable:$true] %s36_s10 }
  0x76   :  { %v22_v5 = vpop.permute.xlu0 %21 }
  0x77   :  { %vm23_vm3 = vcmp.eq.s32.totalorder %v18_v4, %v22_v5 }
  0x78   :  { %v24_v6 = vsel %vm23_vm3, 1.0, %v79_v2 }
  0x79   :  { %26 = vrot.lane.b32.xlu0 %v24_v6, %s80_s8 }
  0xeb   :  { %v27_v7 = vpop.permute.xlu0 %26 }
  0xec   :  { %30 = vst.msk [vmem:[#allocation2 + $0x2] sm:$0x3] %vm29_vm4, %v27_v7 }
  0xed   :  { %41 = dma.vmem_to_hbm [thread:$0]  %s37_s10, 64, %s39_s12, [#allocation3]  }
  0xee   :  { %76 = dma.done.wait [#allocation3], 64  }
  0xef   :  { %77 = vsyncadd [#allocation3], 4294967232 }
  0xf0   :  { %46 = vsyncpa [#allocation3], 1 }

</bundles_post_ra>
